<compile_context>
chip_gen: v7x
topology: tpu7x:2x2x1
jax: 0.10.0
libtpu: 0.0.40
codegen_flags: <defaults>
</compile_context>

<pallas_src>
import functools

import jax
import jax.numpy as jnp
from jax.experimental import pallas as pl
from jax.experimental.pallas import tpu as pltpu


def _vmem_capacity_bytes():
    """Per-core VMEM capacity; conservative 64 MiB fallback (v7x)."""
    try:
        cap = int(pltpu.get_tpu_info().vmem_capacity_bytes)
        if cap > 0:
            return cap
    except Exception:
        pass
    return 64 << 20


def _num_tensorcores():
    """TensorCores per device that a 'parallel' grid axis can shard across."""
    try:
        kind = (jax.devices()[0].device_kind or "").lower().replace(" ", "")
        if "v7" in kind or "tpu7" in kind:
            return 2                      # v7x: 2 TensorCores per chip
        if ("v4" in kind or "v5p" in kind) and "lite" not in kind:
            return 2                      # megacore generations
    except Exception:
        pass
    return 1                              # v5e / v6e: single TensorCore


def _choose_row_tile(n_rows, width, itemsize, vmem_cap, n_cores):
    """Rows per grid step.

    Big enough to sit past the ~2 MiB HBM-roofline knee, small enough that the
    double-buffered HBM-dtype tiles *plus* the f32 intermediates the kernel
    body materializes fit comfortably in scoped VMEM on every generation.
    """
    sub = 8 * max(1, 4 // itemsize)       # packed sublane height: 8/16/32
    if n_rows <= sub:
        return n_rows                     # single full-extent block (legal)

    row_bytes_in = width * itemsize
    # 2x double-buffered input + 2x double-buffered output (HBM dtype) plus
    # ~4 f32 (rows, width) temporaries (x cast, d, d*d, y) inside the body.
    row_bytes_work = width * (4 * itemsize + 4 * 4)

    per_tile_budget = min(4 << 20, vmem_cap // 16)             # input tile
    work_budget = min(24 << 20, max(8 << 20, vmem_cap // 3))   # whole working set

    rows = min(per_tile_budget // row_bytes_in,
               work_budget // row_bytes_work)
    rows = max(sub, min(rows, n_rows))

    if rows >= n_rows:
        # Whole tensor fits in one tile.  Only split in two for dual-TC chips
        # and only if each half still streams a tile above the ~2 MiB knee;
        # otherwise one TensorCore takes a single full-size tile.
        if n_cores >= 2:
            half = -(-n_rows // 2)
            if half * row_bytes_in >= (2 << 20):
                return max(sub, -(-half // sub) * sub)
        return n_rows

    return max(sub, (rows // sub) * sub)


def _layernorm_kernel(x_ref, w_ref, b_ref, o_ref, *, eps, inv_h):
    """Plain path (H >= 128): normalize each row over the last (hidden) axis."""
    # TODO(synk): on v7x (~3.2 TB/s HBM/TC) the two lane-axis reductions can
    # make this VPU/XLU-bound; offload them to the idle MXU (hi/lo split
    # against a 0/1 ones column) once a bundle dump confirms the binding slot.
    x = x_ref[...].astype(jnp.float32)                   # (rows, H)
    u = jnp.sum(x, axis=-1, keepdims=True) * inv_h       # mean
    d = x - u
    s = jnp.sum(d * d, axis=-1, keepdims=True) * inv_h   # biased variance
    y = d * jax.lax.rsqrt(s + eps)                       # eps inside sqrt
    w = w_ref[...].astype(jnp.float32)
    b = b_ref[...].astype(jnp.float32)
    o_ref[...] = (w * y + b).astype(o_ref.dtype)


def _hi_lo_bf16(x):
    """Split f32 into bf16 hi + lo with |x - (hi + lo)| <~ 2^-16 |x|."""
    hi = x.astype(jnp.bfloat16)
    lo = (x - hi.astype(jnp.float32)).astype(jnp.bfloat16)
    return hi, lo


def _avg_dot(x_f32, p_bf16):
    """x @ p at ~f32 accuracy with two DEFAULT-precision bf16 MXU passes.

    p's entries are 0 or 1/H with H a power of two, hence exact in bf16; only
    x needs extra mantissa, supplied by the hi/lo split.  (Previously a single
    Precision.HIGHEST dot: ~6 MXU passes; this uses 2.)
    """
    hi, lo = _hi_lo_bf16(x_f32)
    return (jnp.dot(hi, p_bf16, preferred_element_type=jnp.float32)
            + jnp.dot(lo, p_bf16, preferred_element_type=jnp.float32))


def _layernorm_folded_kernel(x_ref, w_ref, b_ref, p_ref, o_ref, *, eps):
    """Small-H path: g = 128 // H logical rows packed along the lane axis.

    p_ref is the (W, W) block-diagonal averaging matrix (1/H in each HxH
    diagonal block), so `x @ p` hands every lane its own row's mean.  All
    loads/stores are lane-dense; reductions run on the otherwise-idle MXU.
    """
    x = x_ref[...].astype(jnp.float32)                   # (rows, W)
    p = p_ref[...]                                       # (W, W) bf16
    u = _avg_dot(x, p)                                   # per-lane row mean
    d = x - u
    s = _avg_dot(d * d, p)                               # per-lane row variance
    y = d * jax.lax.rsqrt(s + eps)
    w = w_ref[...].astype(jnp.float32)
    b = b_ref[...].astype(jnp.float32)
    o_ref[...] = (w * y + b).astype(o_ref.dtype)


def layer_norm(x, weight, bias, eps=1e-12):
    """x: (..., H); weight, bias: (H,). Returns same shape/dtype as x."""
    orig_shape = x.shape
    H = orig_shape[-1]
    x2 = x.reshape(-1, H)
    R = x2.shape[0]

    itemsize = jnp.dtype(x.dtype).itemsize
    vmem_cap = _vmem_capacity_bytes()
    n_cores = _num_tensorcores()

    # Fold several rows into the 128-lane axis when H < 128 so every
    # load/store is lane-dense.  If R is not a multiple of g, pad with at most
    # g-1 zero rows (cheaper than the lane-sparse masked-store fallback).
    fold = (H < 128) and (128 % H == 0)
    pad_rows = 0
    if fold:
        g = 128 // H
        W = g * H                                # == 128
        pad_rows = (-R) % g
        if pad_rows:
            x2 = jnp.concatenate(
                [x2, jnp.zeros((pad_rows, H), x2.dtype)], axis=0)
        n_rows = (R + pad_rows) // g
        x2 = x2.reshape(n_rows, W)               # contiguous reshape
        w_in = jnp.tile(weight, g).reshape(1, W)
        b_in = jnp.tile(bias, g).reshape(1, W)
        # Block-diagonal averaging matrix; H is a power of two here so 1/H
        # (and hence p) is exactly representable in bf16.
        seg = jnp.arange(W, dtype=jnp.int32) // H
        p = ((seg[:, None] == seg[None, :]).astype(jnp.float32)
             * (1.0 / H)).astype(jnp.bfloat16)
    else:
        W = H
        n_rows = R
        w_in = weight.reshape(1, H)
        b_in = bias.reshape(1, H)

    row_tile = _choose_row_tile(n_rows, W, itemsize, vmem_cap, n_cores)
    grid = (pl.cdiv(n_rows, row_tile),)

    # Double-buffered in/out tiles (HBM dtype) + ~4 f32 intermediates + slack.
    footprint = row_tile * W * (4 * itemsize + 4 * 4) + (4 << 20)
    vmem_limit = int(min(vmem_cap, max(32 << 20, footprint)))

    compiler_params = pltpu.CompilerParams(
        dimension_semantics=("parallel",),
        vmem_limit_bytes=vmem_limit,
    )

    row_spec = pl.BlockSpec((row_tile, W), lambda i: (i, 0))
    vec_spec = pl.BlockSpec((1, W), lambda i: (0, 0))   # resident, never re-DMA'd

    if fold:
        kernel = functools.partial(_layernorm_folded_kernel, eps=eps)
        in_specs = [row_spec, vec_spec, vec_spec,
                    pl.BlockSpec((W, W), lambda i: (0, 0))]
        args = (x2, w_in, b_in, p)
    else:
        kernel = functools.partial(_layernorm_kernel, eps=eps, inv_h=1.0 / H)
        in_specs = [row_spec, vec_spec, vec_spec]
        args = (x2, w_in, b_in)

    out = pl.pallas_call(
        kernel,
        out_shape=jax.ShapeDtypeStruct((n_rows, W), x.dtype),
        grid_spec=pltpu.PrefetchScalarGridSpec(
            num_scalar_prefetch=0,
            grid=grid,
            in_specs=in_specs,
            out_specs=row_spec,
        ),
        compiler_params=compiler_params,
    )(*args)

    if fold:
        out = out.reshape(R + pad_rows, H)
        if pad_rows:
            out = out[:R]
    return out.reshape(orig_shape)


if __name__ == "__main__":
    def reference(x, w, b, eps):
        xf = x.astype(jnp.float32)
        u = jnp.mean(xf, axis=-1, keepdims=True)
        s = jnp.mean((xf - u) ** 2, axis=-1, keepdims=True)
        y = w.astype(jnp.float32) * ((xf - u) / jnp.sqrt(s + eps)) \
            + b.astype(jnp.float32)
        return y.astype(x.dtype)

    key = jax.random.PRNGKey(0)
    ks = jax.random.split(key, 8)

    # 1) Primary case matching the module spec: H=32 (folded lane-dense path),
    #    ones weight / zeros bias.
    batch, seq, hidden = 2, 8, 32
    x = jax.random.normal(ks[0], (batch, seq, hidden), dtype=jnp.float32)
    weight = jnp.ones((hidden,), dtype=jnp.float32)
    bias = jnp.zeros((hidden,), dtype=jnp.float32)
    y = jax.block_until_ready(layer_norm(x, weight, bias, eps=1e-12))
    # hi/lo bf16 reductions: reconstruction error <= ~2^-16, well inside 2e-5.
    assert jnp.allclose(y, reference(x, weight, bias, 1e-12),
                        atol=2e-5, rtol=1e-5), "folded path mismatch"

    # 2) Lane-dense plain path (H >= 128) with non-trivial affine params.
    x2 = jax.random.normal(ks[1], (2, 10, 256), dtype=jnp.float32)
    w2 = 1.0 + 0.1 * jax.random.normal(ks[2], (256,), dtype=jnp.float32)
    b2 = 0.1 * jax.random.normal(ks[3], (256,), dtype=jnp.float32)
    y2 = jax.block_until_ready(layer_norm(x2, w2, b2, eps=1e-12))
    assert jnp.allclose(y2, reference(x2, w2, b2, 1e-12),
                        atol=1e-5, rtol=1e-5), "plain path mismatch"

    # 3) Folded path with R not a multiple of g (exercises the zero-row pad).
    x3 = jax.random.normal(ks[4], (1, 5, 32), dtype=jnp.float32)
    y3 = jax.block_until_ready(layer_norm(x3, weight, bias, eps=1e-12))
    assert jnp.allclose(y3, reference(x3, weight, bias, 1e-12),
                        atol=2e-5, rtol=1e-5), "padded folded path mismatch"

    # 4) bf16 input: exercises 16-row sublane granularity and the
    #    f32-working-set-aware tile sizing.
    x4 = jax.random.normal(ks[5], (2, 64, 512), dtype=jnp.bfloat16)
    w4 = jnp.ones((512,), dtype=jnp.bfloat16)
    b4 = jnp.zeros((512,), dtype=jnp.bfloat16)
    y4 = jax.block_until_ready(layer_norm(x4, w4, b4, eps=1e-12))
    assert jnp.allclose(y4.astype(jnp.float32),
                        reference(x4, w4, b4, 1e-12).astype(jnp.float32),
                        atol=2e-2, rtol=2e-2), "bf16 path mismatch"

    # 5) Multi-grid-step plain path with a partial (masked) last block.
    x5 = jax.random.normal(ks[6], (4000, 768), dtype=jnp.float32)
    w5 = jnp.ones((768,), dtype=jnp.float32)
    b5 = jnp.zeros((768,), dtype=jnp.float32)
    y5 = jax.block_until_ready(layer_norm(x5, w5, b5, eps=1e-12))
    assert jnp.allclose(y5, reference(x5, w5, b5, 1e-12),
                        atol=1e-5, rtol=1e-5), "multi-step path mismatch"

    print("KERNEL_OK")
</pallas_src>

<mosaic_0001>
module attributes {stable_mosaic.version = 11 : i64} {
  func.func @_layernorm_folded_kernel(%arg0: i32, %arg1: memref<4x128xf32, #tpu.memory_space<vmem>>, %arg2: memref<1x128xf32, #tpu.memory_space<vmem>>, %arg3: memref<1x128xf32, #tpu.memory_space<vmem>>, %arg4: memref<128x128xbf16, #tpu.memory_space<vmem>>, %arg5: memref<4x128xf32, #tpu.memory_space<vmem>>) attributes {dimension_semantics = [#tpu.dimension_semantics<parallel>], iteration_bounds = array<i64: 1>, scalar_prefetch = 0 : i64, scratch_operands = 0 : i64, tpu.core_type = #tpu.core_type<tc>, window_params = [{transform_indices = @transform_0, window_bounds = array<i64: 4, 128>}, {pipeline_mode = #tpu.pipeline_mode<synchronous>, transform_indices = @transform_1, window_bounds = array<i64: 1, 128>}, {pipeline_mode = #tpu.pipeline_mode<synchronous>, transform_indices = @transform_2, window_bounds = array<i64: 1, 128>}, {pipeline_mode = #tpu.pipeline_mode<synchronous>, transform_indices = @transform_3, window_bounds = array<i64: 128, 128>}, {transform_indices = @transform_4, window_bounds = array<i64: 4, 128>}]} {
    %c0 = arith.constant 0 : index
    %c0_0 = arith.constant 0 : index
    %0 = vector.load %arg1[%c0, %c0_0] : memref<4x128xf32, #tpu.memory_space<vmem>>, vector<4x128xf32>
    %c0_1 = arith.constant 0 : index
    %c0_2 = arith.constant 0 : index
    %1 = vector.load %arg4[%c0_1, %c0_2] : memref<128x128xbf16, #tpu.memory_space<vmem>>, vector<128x128xbf16>
    %2 = arith.truncf %0 : vector<4x128xf32> to vector<4x128xbf16>
    %3 = arith.extf %2 : vector<4x128xbf16> to vector<4x128xf32>
    %4 = arith.subf %0, %3 : vector<4x128xf32>
    %5 = arith.truncf %4 : vector<4x128xf32> to vector<4x128xbf16>
    %cst = arith.constant dense<0.000000e+00> : vector<4x128xf32>
    %6 = tpu.matmul %2, %1, %cst {dimension_numbers = #tpu.dot_dimension_numbers<[1], [0], [0], [1], [0, 0, 1, 1], [], []>} : vector<4x128xbf16>, vector<128x128xbf16>, vector<4x128xf32> -> vector<4x128xf32>
    %cst_3 = arith.constant dense<0.000000e+00> : vector<4x128xf32>
    %7 = tpu.matmul %5, %1, %cst_3 {dimension_numbers = #tpu.dot_dimension_numbers<[1], [0], [0], [1], [0, 0, 1, 1], [], []>} : vector<4x128xbf16>, vector<128x128xbf16>, vector<4x128xf32> -> vector<4x128xf32>
    %8 = arith.addf %6, %7 : vector<4x128xf32>
    %9 = arith.subf %0, %8 : vector<4x128xf32>
    %10 = arith.mulf %9, %9 : vector<4x128xf32>
    %11 = arith.truncf %10 : vector<4x128xf32> to vector<4x128xbf16>
    %12 = arith.extf %11 : vector<4x128xbf16> to vector<4x128xf32>
    %13 = arith.subf %10, %12 : vector<4x128xf32>
    %14 = arith.truncf %13 : vector<4x128xf32> to vector<4x128xbf16>
    %cst_4 = arith.constant dense<0.000000e+00> : vector<4x128xf32>
    %15 = tpu.matmul %11, %1, %cst_4 {dimension_numbers = #tpu.dot_dimension_numbers<[1], [0], [0], [1], [0, 0, 1, 1], [], []>} : vector<4x128xbf16>, vector<128x128xbf16>, vector<4x128xf32> -> vector<4x128xf32>
    %cst_5 = arith.constant dense<0.000000e+00> : vector<4x128xf32>
    %16 = tpu.matmul %14, %1, %cst_5 {dimension_numbers = #tpu.dot_dimension_numbers<[1], [0], [0], [1], [0, 0, 1, 1], [], []>} : vector<4x128xbf16>, vector<128x128xbf16>, vector<4x128xf32> -> vector<4x128xf32>
    %17 = arith.addf %15, %16 : vector<4x128xf32>
    %cst_6 = arith.constant 9.99999996E-13 : f32
    %18 = vector.broadcast %cst_6 : f32 to vector<4x128xf32>
    %19 = arith.addf %17, %18 : vector<4x128xf32>
    %20 = math.rsqrt %19 : vector<4x128xf32>
    %21 = arith.mulf %9, %20 : vector<4x128xf32>
    %c0_7 = arith.constant 0 : index
    %c0_8 = arith.constant 0 : index
    %22 = vector.load %arg2[%c0_7, %c0_8] : memref<1x128xf32, #tpu.memory_space<vmem>>, vector<1x128xf32>
    %c0_9 = arith.constant 0 : index
    %c0_10 = arith.constant 0 : index
    %23 = vector.load %arg3[%c0_9, %c0_10] : memref<1x128xf32, #tpu.memory_space<vmem>>, vector<1x128xf32>
    %24 = vector.broadcast %22 : vector<1x128xf32> to vector<4x128xf32>
    %25 = arith.mulf %24, %21 : vector<4x128xf32>
    %26 = vector.broadcast %23 : vector<1x128xf32> to vector<4x128xf32>
    %27 = arith.addf %25, %26 : vector<4x128xf32>
    %c0_11 = arith.constant 0 : index
    %c0_12 = arith.constant 0 : index
    %28 = vector.load %arg5[%c0_11, %c0_12] : memref<4x128xf32, #tpu.memory_space<vmem>>, vector<4x128xf32>
    tpu.vector_store %arg5[%c0_11, %c0_12], %27 {strides = array<i32>} : memref<4x128xf32, #tpu.memory_space<vmem>>, vector<4x128xf32>,
    return
  }
  func.func @transform_0(%arg0: i32) -> (i32, i32) {
    %c0_i32 = arith.constant 0 : i32
    %c0_i32_0 = arith.constant 0 : i32
    return %arg0, %c0_i32 : i32, i32
  }
  func.func @transform_1(%arg0: i32) -> (i32, i32) {
    %c0_i32 = arith.constant 0 : i32
    %c0_i32_0 = arith.constant 0 : i32
    %c0_i32_1 = arith.constant 0 : i32
    return %c0_i32, %c0_i32_0 : i32, i32
  }
  func.func @transform_2(%arg0: i32) -> (i32, i32) {
    %c0_i32 = arith.constant 0 : i32
    %c0_i32_0 = arith.constant 0 : i32
    %c0_i32_1 = arith.constant 0 : i32
    return %c0_i32, %c0_i32_0 : i32, i32
  }
  func.func @transform_3(%arg0: i32) -> (i32, i32) {
    %c0_i32 = arith.constant 0 : i32
    %c0_i32_0 = arith.constant 0 : i32
    %c0_i32_1 = arith.constant 0 : i32
    return %c0_i32, %c0_i32_0 : i32, i32
  }
  func.func @transform_4(%arg0: i32) -> (i32, i32) {
    %c0_i32 = arith.constant 0 : i32
    %c0_i32_0 = arith.constant 0 : i32
    return %arg0, %c0_i32 : i32, i32
  }
}

</mosaic_0001>

<bundles_post_ra>
// kernel: tpu_custom_call.1
= control target key start
LH: loop header
LB: loop body
LE: loop exit
PB: predicated region body
PF: predicated region fallthrough
CT: control target
= control target key end

     0   :  { %9 = vsyncpa [#allocation3], 0  ;;  %s686_s0 = inlined_call_operand.hbm [shape: f32[4,128], index: 0, kind: input, shape index: {}]   ;;  %s687_s1 = inlined_call_operand.vmem [shape: f32[1,128], index: 1, kind: input, shape index: {}]   ;;  %s688_s2 = inlined_call_operand.vmem [shape: f32[1,128], index: 2, kind: input, shape index: {}]   ;;  %s689_s3 = inlined_call_operand.hbm [shape: bf16[128,128], index: 3, kind: input, shape index: {}]   ;;  %s690_s4 = inlined_call_operand.hbm [shape: f32[4,128], index: 4, kind: output, shape index: {}]  }
   0x1   :  { %10 = vsyncpa [#allocation6], 0 }
   0x2   :  { %11 = vsyncpa [#allocation4], 0  ;;  %s535_s15 = smov [#allocation2]   ;;  %s536_s17 = smov [#allocation5]  }
   0x3   :  { %s18_s16 = sshll.u32 %s535_s15, 4  ;;  %s31_s18 = sshll.u32 %s536_s17, 4  ;;  %s19_s16 = int_to_ptr.vmem [resolvable:$true] %s18_s16  ;;  %s567_s18 = int_to_ptr.vmem [resolvable:$true] %s31_s18 }
   0x4   :  { %s463_s21 = scalar_lea.hbm %s686_s0, 64 }
   0x5   :  { %p464_p0 = scmp.ne.s32.totalorder %s686_s0, %s463_s21  ;;  %p467_p1 = scmp.lt.u32.totalorder %s463_s21, %s686_s0 }
   0x7   :  { %p469_p2 = pnand %p467_p1, %p464_p0 }
   0x9   :  { %472 = shalt.err (!%p469_p2)
}
   0xa   :  { %s473_s26 = scalar_lea.vmem %s19_s16, 64  ;;  %p478_p4 = scmp.lt.s32.totalorder %s19_s16, %s19_s16 }
   0xb   :  { %p474_p3 = scmp.ne.s32.totalorder %s19_s16, %s473_s26  ;;  %p479_p5 = scmp.lt.s32.totalorder %s473_s26, %s473_s26 }
   0xd   :  { %p480_p6 = por %p479_p5, %p478_p4 }
   0xf   :  { %p481_p7 = pnand %p480_p6, %p474_p3 }
  0x11   :  { %484 = shalt.err (!%p481_p7)
}
  0x12   :  { %21 = dma.hbm_to_vmem [thread:$0]  %s686_s0, 64, %s19_s16, [#allocation3]  }
  0x13   :  { %s485_s5 = scalar_lea.hbm %s689_s3, 1024 }
  0x14   :  { %p486_p8 = scmp.ne.s32.totalorder %s689_s3, %s485_s5  ;;  %p489_p9 = scmp.lt.u32.totalorder %s485_s5, %s689_s3 }
  0x16   :  { %p491_p10 = pnand %p489_p9, %p486_p8 }
  0x18   :  { %494 = shalt.err (!%p491_p10)
}
  0x19   :  { %s495_s10 = scalar_lea.vmem %s567_s18, 1024  ;;  %p500_p12 = scmp.lt.s32.totalorder %s567_s18, %s567_s18 }
  0x1a   :  { %p496_p11 = scmp.ne.s32.totalorder %s567_s18, %s495_s10  ;;  %p501_p13 = scmp.lt.s32.totalorder %s495_s10, %s495_s10 }
  0x1c   :  { %p502_p0 = por %p501_p13, %p500_p12 }
  0x1e   :  { %p503_p1 = pnand %p502_p0, %p496_p11 }
  0x20   :  { %506 = shalt.err (!%p503_p1)
}
  0x21   :  { %s537_s0 = smov 64   ;;  %s538_s11 = smov 4  }
  0x22   :  { %37 = dma.hbm_to_vmem [thread:$0]  %s689_s3, 1024, %s567_s18, [#allocation6], %s537_s0, %s537_s0, %s538_s11  }
  0x23   :  { %529 = dma.done.wait [#allocation3], 64  }
  0x24   :  { %530 = vsyncadd [#allocation3], 4294967232 }
  0x25   :  { %531 = dma.done.wait [#allocation6], 1024  }
  0x26   :  { %532 = vsyncadd [#allocation6], 4294966272  ;;  %v539_v0 = vmov 0.0   ;;  %vm540_vm0 = vmmov 0   ;;  %v604_v1 = vld [vmem:[#allocation5] sm:$0xff]   ;;  %v607_v2 = vld [vmem:[#allocation5 + $0x8] sm:$0xff]  }
  0x27   :  { %362 = vmatprep.subr.bf16.mxu0 %v539_v0  ;;  %378 = vmatprep.mubr.msk.bf16.mxu0 %vm540_vm0, %v539_v0  ;;  %v613_v3 = vld [vmem:[#allocation5 + $0x10] sm:$0xff]   ;;  %v619_v4 = vld [vmem:[#allocation5 + $0x18] sm:$0xff]   ;;  %v625_v5 = vld [vmem:[#allocation5 + $0x20] sm:$0xff]   ;;  %s541_s17 = smov [#allocation7]  }
  0x28   :  { %402 = vmatprep.subr.bf16.mxu1 %v539_v0  ;;  %418 = vmatprep.mubr.msk.bf16.mxu1 %vm540_vm0, %v539_v0  ;;  %v45_v6 = vld [vmem:[#allocation2] sm:$0xf]  ;;  %v458_v8 = vld [vmem:[#allocation5 + $0x28] sm:$0xff]   ;;  %v459_v10 = vld [vmem:[#allocation5 + $0x30] sm:$0xff]   ;;  %s306_s18 = sshll.u32 %s541_s17, 4  ;;  %s307_s18 = int_to_ptr.vmem [resolvable:$true] %s306_s18 }
  0x29   :  { %363 = vmatpush3.bf16.msra.mxu0 %v604_v1  ;;  %403 = vmatpush3.bf16.msra.mxu1 %v604_v1  ;;  %v62_v7 = vpack.c.bf16 %v45_v6, %v45_v6  ;;  %v460_v12 = vld [vmem:[#allocation5 + $0x38] sm:$0xff]   ;;  %s507_s19 = scalar_lea.vmem %s307_s18, 64  ;;  %p512_p3 = scmp.lt.s32.totalorder %s307_s18, %s307_s18 }
  0x2a   :  { %364 = vmatprep.subr.bf16.mxu0 %v539_v0  ;;  %404 = vmatprep.subr.bf16.mxu1 %v539_v0  ;;  %v324_v35 = vld [vmem:[%s687_s1] ss:$0 sm:$0xff]  ;;  %p508_p2 = scmp.ne.s32.totalorder %s307_s18, %s507_s19  ;;  %p513_p4 = scmp.lt.s32.totalorder %s507_s19, %s507_s19 }
  0x2b   :  { %v63_v9 = vunpack.c.l.bf16 %v62_v7  ;;  %v325_v37 = vld [vmem:[%s688_s2] ss:$0 sm:$0xff] }
  0x2c   :  { %p514_p5 = por %p513_p4, %p512_p3 }
  0x2d   :  { %365 = vmatpush3.bf16.msra.mxu0 %v607_v2  ;;  %405 = vmatpush3.bf16.msra.mxu1 %v607_v2  ;;  %v64_v11 = vsub.f32 %v45_v6, %v63_v9 }
  0x2e   :  { %366 = vmatprep.subr.bf16.mxu0 %v539_v0  ;;  %406 = vmatprep.subr.bf16.mxu1 %v539_v0  ;;  %p515_p6 = pnand %p514_p5, %p508_p2 }
  0x2f   :  { %v65_v13 = vpack.c.bf16 %v64_v11, %v64_v11 }
  0x31   :  { %367 = vmatpush3.bf16.msra.mxu0 %v613_v3  ;;  %407 = vmatpush3.bf16.msra.mxu1 %v613_v3 }
  0x32   :  { %368 = vmatprep.subr.bf16.mxu0 %v539_v0  ;;  %408 = vmatprep.subr.bf16.mxu1 %v539_v0 }
  0x35   :  { %369 = vmatpush3.bf16.msra.mxu0 %v619_v4  ;;  %409 = vmatpush3.bf16.msra.mxu1 %v619_v4 }
  0x36   :  { %370 = vmatprep.subr.bf16.mxu0 %v539_v0  ;;  %410 = vmatprep.subr.bf16.mxu1 %v539_v0 }
  0x39   :  { %371 = vmatpush3.bf16.msra.mxu0 %v625_v5  ;;  %411 = vmatpush3.bf16.msra.mxu1 %v625_v5 }
  0x3a   :  { %372 = vmatprep.subr.bf16.mxu0 %v539_v0  ;;  %412 = vmatprep.subr.bf16.mxu1 %v539_v0 }
  0x3d   :  { %373 = vmatpush3.bf16.msra.mxu0 %v458_v8  ;;  %413 = vmatpush3.bf16.msra.mxu1 %v458_v8 }
  0x3e   :  { %374 = vmatprep.subr.bf16.mxu0 %v539_v0  ;;  %414 = vmatprep.subr.bf16.mxu1 %v539_v0 }
  0x41   :  { %375 = vmatpush3.bf16.msra.mxu0 %v459_v10  ;;  %415 = vmatpush3.bf16.msra.mxu1 %v459_v10 }
  0x42   :  { %376 = vmatprep.subr.bf16.mxu0 %v539_v0  ;;  %416 = vmatprep.subr.bf16.mxu1 %v539_v0 }
  0x45   :  { %377 = vmatpush3.bf16.msra.mxu0 %v460_v12  ;;  %417 = vmatpush3.bf16.msra.mxu1 %v460_v12 }
  0x46   :  { %382 = vmatprep.subr.bf16.mxu0 %v539_v0  ;;  %422 = vmatprep.subr.bf16.mxu1 %v539_v0 }
  0x48   :  { %379 = vmatmul.mubr.bf16.vlgmr.msra.gmra.mrb[0].mxu0 %v65_v13 }
  0x49   :  { %383 = vmatpush3.bf16.msra.mxu0 %v604_v1  ;;  %398 = vmatprep.mubr.msk.bf16.mxu0 %vm540_vm0, %v539_v0 }
  0x4a   :  { %384 = vmatprep.subr.bf16.mxu0 %v539_v0 }
  0x4d   :  { %385 = vmatpush3.bf16.msra.mxu0 %v607_v2 }
  0x4e   :  { %386 = vmatprep.subr.bf16.mxu0 %v539_v0 }
  0x51   :  { %387 = vmatpush3.bf16.msra.mxu0 %v613_v3 }
  0x52   :  { %388 = vmatprep.subr.bf16.mxu0 %v539_v0 }
  0x55   :  { %389 = vmatpush3.bf16.msra.mxu0 %v619_v4 }
  0x56   :  { %390 = vmatprep.subr.bf16.mxu0 %v539_v0 }
  0x59   :  { %391 = vmatpush3.bf16.msra.mxu0 %v625_v5 }
  0x5a   :  { %392 = vmatprep.subr.bf16.mxu0 %v539_v0 }
  0x5d   :  { %393 = vmatpush3.bf16.msra.mxu0 %v458_v8 }
  0x5e   :  { %394 = vmatprep.subr.bf16.mxu0 %v539_v0 }
  0x61   :  { %395 = vmatpush3.bf16.msra.mxu0 %v459_v10 }
  0x62   :  { %396 = vmatprep.subr.bf16.mxu0 %v539_v0 }
  0x65   :  { %397 = vmatpush3.bf16.msra.mxu0 %v460_v12 }
  0x68   :  { %399 = vmatmul.mubr.bf16.vlgmr.msra.gmra.mrb[0].mxu0 %v62_v7 }
 0x13b   :  { %v188_v14 = vpop.f32.mrb[0].mxu0 }
 0x13c   :  { %v194_v15 = vsub.f32 %v45_v6, %v188_v14  ;;  %v400_v16 = vpop.f32.mrb[1].mxu0 }
 0x13d   :  { %v191_v17 = vpop.f32.mrb[2].mxu0 }
 0x13e   :  { %v195_v18 = vmul.f32 %v194_v15, %v194_v15  ;;  %v401_v19 = vpop.f32.mrb[3].mxu0 }
 0x140   :  { %v196_v20 = vpack.c.bf16 %v195_v18, %v195_v18 }
 0x142   :  { %v197_v21 = vunpack.c.l.bf16 %v196_v20 }
 0x144   :  { %v198_v22 = vsub.f32 %v195_v18, %v197_v21 }
 0x146   :  { %v199_v23 = vpack.c.bf16 %v198_v22, %v198_v22 }
 0x148   :  { %419 = vmatmul.mubr.bf16.vlgmr.msra.gmra.mrb[0].mxu1 %v199_v23 }
 0x149   :  { %423 = vmatpush3.bf16.msra.mxu1 %v604_v1  ;;  %438 = vmatprep.mubr.msk.bf16.mxu1 %vm540_vm0, %v539_v0 }
 0x14a   :  { %424 = vmatprep.subr.bf16.mxu1 %v539_v0 }
 0x14d   :  { %425 = vmatpush3.bf16.msra.mxu1 %v607_v2 }
 0x14e   :  { %426 = vmatprep.subr.bf16.mxu1 %v539_v0 }
 0x151   :  { %427 = vmatpush3.bf16.msra.mxu1 %v613_v3 }
 0x152   :  { %428 = vmatprep.subr.bf16.mxu1 %v539_v0 }
 0x155   :  { %429 = vmatpush3.bf16.msra.mxu1 %v619_v4 }
 0x156   :  { %430 = vmatprep.subr.bf16.mxu1 %v539_v0 }
 0x159   :  { %431 = vmatpush3.bf16.msra.mxu1 %v625_v5 }
 0x15a   :  { %432 = vmatprep.subr.bf16.mxu1 %v539_v0 }
 0x15d   :  { %433 = vmatpush3.bf16.msra.mxu1 %v458_v8 }
 0x15e   :  { %434 = vmatprep.subr.bf16.mxu1 %v539_v0 }
 0x161   :  { %435 = vmatpush3.bf16.msra.mxu1 %v459_v10 }
 0x162   :  { %436 = vmatprep.subr.bf16.mxu1 %v539_v0 }
 0x165   :  { %437 = vmatpush3.bf16.msra.mxu1 %v460_v12 }
 0x168   :  { %439 = vmatmul.mubr.bf16.vlgmr.msra.gmra.mrb[4].mxu1 %v196_v20 }
 0x21b   :  { %v234_v24 = vpop.f32.mrb[0].mxu1 }
 0x21c   :  { %v420_v25 = vpop.f32.mrb[1].mxu1 }
 0x21d   :  { %v237_v26 = vpop.f32.mrb[2].mxu1 }
 0x21e   :  { %v421_v27 = vpop.f32.mrb[3].mxu1 }
 0x23b   :  { %v274_v28 = vpop.f32.mrb[4].mxu1 }
 0x23c   :  { %v275_v29 = vadd.f32 %v274_v28, %v234_v24  ;;  %v440_v30 = vpop.f32.mrb[5].mxu1 }
 0x23d   :  { %v277_v31 = vpop.f32.mrb[6].mxu1 }
 0x23e   :  { %v280_v32 = vadd.f32 1e-12, %v275_v29  ;;  %v441_v33 = vpop.f32.mrb[7].mxu1 }
 0x240   :  { %461 = vrsqrt.f32 %v280_v32 }
 0x24a   :  { %v462_v34 = vpop.eup %461 }
 0x24b   :  { %v282_v36 = vmul.f32 %v462_v34, %v194_v15 }
 0x24d   :  { %v291_v38 = vmul.f32 %v324_v35, %v282_v36 }
 0x24f   :  { %v298_v39 = vadd.f32 %v325_v37, %v291_v38 }
 0x251   :  { %299 = vst [vmem:[#allocation7] sm:$0xf] %v298_v39 }
 0x252   :  { %518 = shalt.err (!%p515_p6)
}
 0x253   :  { %s519_s21 = scalar_lea.hbm %s690_s4, 64 }
 0x254   :  { %p520_p7 = scmp.ne.s32.totalorder %s690_s4, %s519_s21  ;;  %p523_p8 = scmp.lt.u32.totalorder %s519_s21, %s690_s4 }
 0x256   :  { %p525_p9 = pnand %p523_p8, %p520_p7 }
 0x258   :  { %528 = shalt.err (!%p525_p9)
}
 0x259   :  { %309 = dma.vmem_to_hbm [thread:$0]  %s307_s18, 64, %s690_s4, [#allocation4]  }
 0x25a   :  { %533 = dma.done.wait [#allocation4], 64  }
 0x25b   :  { %534 = vsyncadd [#allocation4], 4294967232 }
 0x25c   :  { %313 = vsyncpa [#allocation3], 1 }
 0x25d   :  { %314 = vsyncpa [#allocation6], 1 }
 0x25e   :  { %315 = vsyncpa [#allocation4], 1 }

</bundles_post_ra>
